<compile_context>
chip_gen: v7x
topology: tpu7x:2x2x1
jax: 0.10.0
libtpu: 0.0.40
codegen_flags: <defaults>
</compile_context>

<pallas_src>
import functools

import jax
import jax.numpy as jnp
from jax import lax
from jax.experimental import pallas as pl
from jax.experimental.pallas import tpu as pltpu

LANES = 128
SUBLANES = 8
CHUNK_ROWS = 64          # rows streamed per fori_loop step (8 f32 vregs)


def _round_up(x, m):
    return ((x + m - 1) // m) * m


def _burgers_loss_kernel(pred_ref, tgt_ref, out_ref, *,
                         N_0, N_b, N_f, n_total, tile_rows, n_tgt_chunks):
    """One grid step: accumulate weighted squared errors of a (tile_rows,128) tile."""
    i = pl.program_id(0)
    n_head = N_0 + 2 * N_b
    tile_elems = tile_rows * LANES
    base = i * tile_elems
    n_chunks = tile_rows // CHUNK_ROWS

    inv0 = jnp.float32(1.0 / N_0)
    invb = jnp.float32(1.0 / N_b)
    invf = jnp.float32(1.0 / N_f)

    # Init resident accumulator (same output block every step).
    @pl.when(i == 0)
    def _init():
        out_ref[...] = jnp.zeros_like(out_ref)

    # --------------------------------------------------------------- fast path
    # Tile lies entirely inside the PDE-residual segment and inside the valid
    # range: no masks, no target, no padding/garbage -> sum(x*x) * (1/N_f).
    is_interior = jnp.logical_and(base >= n_head, base + tile_elems <= n_total)

    @pl.when(is_interior)
    def _interior():
        def body(c, acc):
            blk = pred_ref[pl.ds(c * CHUNK_ROWS, CHUNK_ROWS), :].astype(jnp.float32)
            sq = blk * blk
            return acc + jnp.sum(
                sq.reshape(CHUNK_ROWS // SUBLANES, SUBLANES, LANES), axis=0)

        partial = lax.fori_loop(0, n_chunks, body,
                                jnp.zeros((SUBLANES, LANES), jnp.float32),
                                unroll=True)
        out_ref[...] += partial * invf

    # --------------------------------------------------------------- edge path
    # First tile (IC + boundary segments + target) and/or ragged last tile.
    @pl.when(jnp.logical_not(is_interior))
    def _edge():
        def body(c, acc):
            r0 = c * CHUNK_ROWS
            blk = pred_ref[pl.ds(r0, CHUNK_ROWS), :].astype(jnp.float32)

            row_iota = lax.broadcasted_iota(jnp.int32, (CHUNK_ROWS, LANES), 0)
            lane_iota = lax.broadcasted_iota(jnp.int32, (CHUNK_ROWS, LANES), 1)
            idx = base + r0 * LANES + row_iota * LANES + lane_iota

            valid = idx < n_total
            # Zero pad / stale-VMEM garbage BEFORE squaring (NaN * 0 == NaN).
            blk = jnp.where(valid, blk, jnp.float32(0.0))

            m0 = idx < N_0
            mb = jnp.logical_and(idx >= N_0, idx < n_head)
            w = jnp.where(m0, inv0,
                jnp.where(mb, invb,
                jnp.where(valid, invf, jnp.float32(0.0))))

            # Target can only overlap chunk `c` of tile 0 (tr*128 >= N_0 by
            # construction); clamp the chunk index so the read stays in bounds
            # everywhere else (where m0 is all-false and the value is ignored).
            tc = jnp.minimum(c, n_tgt_chunks - 1)
            tgt_blk = tgt_ref[pl.ds(tc * CHUNK_ROWS, CHUNK_ROWS), :]
            d = jnp.where(m0, blk - tgt_blk, blk)

            contrib = w * d * d
            return acc + jnp.sum(
                contrib.reshape(CHUNK_ROWS // SUBLANES, SUBLANES, LANES), axis=0)

        partial = lax.fori_loop(0, n_chunks, body,
                                jnp.zeros((SUBLANES, LANES), jnp.float32))
        out_ref[...] += partial


def burgers_loss(predictions, u_0_target, *, N_0, N_b, N_f, tile_rows=2048):
    """Pallas-backed equivalent of BurgersLoss.forward."""
    assert N_0 > 0 and N_b > 0 and N_f > 0, "segment sizes must be positive"

    pred_flat = jnp.reshape(predictions, (-1,))
    if pred_flat.dtype not in (jnp.float32, jnp.bfloat16):
        pred_flat = pred_flat.astype(jnp.float32)
    tgt_flat = jnp.reshape(u_0_target, (-1,)).astype(jnp.float32)

    n_total = pred_flat.shape[0]
    assert n_total == N_0 + 2 * N_b + N_f, "predictions length mismatch"
    assert tgt_flat.shape[0] == N_0, "target length mismatch"

    # Minimal padding: next multiple of CHUNK_ROWS*128 elements (<= 8191 zeros);
    # no pad op at all when already aligned.
    rows_arr = _round_up(-(-n_total // LANES), CHUNK_ROWS)
    rows_t = _round_up(max(1, -(-N_0 // LANES)), CHUNK_ROWS)

    tr = _round_up(max(CHUNK_ROWS, min(int(tile_rows), rows_arr)), CHUNK_ROWS)
    tr = min(max(tr, rows_t), rows_arr)        # target fits in tile 0; tile <= array
    num_tiles = -(-rows_arr // tr)

    pred_pad = rows_arr * LANES - n_total
    pred_slab = (pred_flat if pred_pad == 0
                 else jnp.pad(pred_flat, (0, pred_pad))).reshape(rows_arr, LANES)
    tgt_slab = jnp.pad(tgt_flat, (0, rows_t * LANES - N_0)).reshape(rows_t, LANES)

    kernel = functools.partial(
        _burgers_loss_kernel,
        N_0=N_0, N_b=N_b, N_f=N_f, n_total=n_total,
        tile_rows=tr, n_tgt_chunks=rows_t // CHUNK_ROWS)

    acc = pl.pallas_call(
        kernel,
        out_shape=jax.ShapeDtypeStruct((SUBLANES, LANES), jnp.float32),
        grid_spec=pltpu.PrefetchScalarGridSpec(
            num_scalar_prefetch=0,
            grid=(num_tiles,),
            in_specs=[
                pl.BlockSpec((tr, LANES), lambda i: (i, 0)),        # prediction tiles
                pl.BlockSpec((rows_t, LANES), lambda i: (0, 0)),    # resident target
            ],
            out_specs=pl.BlockSpec((SUBLANES, LANES), lambda i: (0, 0)),
        ),
        compiler_params=pltpu.CompilerParams(
            dimension_semantics=("arbitrary",)),
    )(pred_slab, tgt_slab)

    # Single tiny cross-lane reduce outside the hot loop.
    return jnp.sum(acc)


def burgers_loss_ref(predictions, u_0_target, *, N_0, N_b, N_f):
    """Pure-JAX reference mirroring the PyTorch module."""
    p = jnp.reshape(predictions, (-1,)).astype(jnp.float32)
    t = jnp.reshape(u_0_target, (-1,)).astype(jnp.float32)
    u_0_pred = p[0:N_0]
    u_b_left = p[N_0:N_0 + N_b]
    u_b_right = p[N_0 + N_b:N_0 + 2 * N_b]
    pde_res = p[N_0 + 2 * N_b:]
    loss_0 = jnp.mean((u_0_pred - t) ** 2)
    loss_b = jnp.mean(u_b_left ** 2) + jnp.mean(u_b_right ** 2)
    loss_f = jnp.mean(pde_res ** 2)
    return loss_0 + loss_b + loss_f


if __name__ == "__main__":
    key = jax.random.PRNGKey(0)
    k1, k2, k3, k4 = jax.random.split(key, 4)

    # Case 1: tiny single-tile problem (all-edge path).
    N_0, N_b, N_f = 16, 8, 96                       # total = 128
    n_tot = N_0 + 2 * N_b + N_f
    preds = jax.random.normal(k1, (n_tot, 1), dtype=jnp.float32)
    tgt = jax.random.normal(k2, (N_0, 1), dtype=jnp.float32)
    out = jax.block_until_ready(burgers_loss(preds, tgt, N_0=N_0, N_b=N_b, N_f=N_f))
    ref = burgers_loss_ref(preds, tgt, N_0=N_0, N_b=N_b, N_f=N_f)
    assert jnp.allclose(out, ref, rtol=1e-5, atol=1e-6), (out, ref)

    # Case 2: multi-tile, exercises the interior fast path + zero-padded tail.
    N_0b, N_bb, N_fb = 50, 50, 19896                # total = 20046
    n_tot_b = N_0b + 2 * N_bb + N_fb
    preds_b = jax.random.normal(k3, (n_tot_b, 1), dtype=jnp.float32)
    tgt_b = jax.random.normal(k4, (N_0b, 1), dtype=jnp.float32)
    ref_b = burgers_loss_ref(preds_b, tgt_b, N_0=N_0b, N_b=N_bb, N_f=N_fb)
    out_b = jax.block_until_ready(
        burgers_loss(preds_b, tgt_b, N_0=N_0b, N_b=N_bb, N_f=N_fb, tile_rows=64))
    assert jnp.allclose(out_b, ref_b, rtol=1e-5, atol=1e-6), (out_b, ref_b)

    # Case 3: same data, last block overhangs the array (ragged edge block,
    # stale-VMEM rows must be masked in-kernel).
    out_c = jax.block_until_ready(
        burgers_loss(preds_b, tgt_b, N_0=N_0b, N_b=N_bb, N_f=N_fb, tile_rows=128))
    assert jnp.allclose(out_c, ref_b, rtol=1e-5, atol=1e-6), (out_c, ref_b)

    # Case 4: bf16 predictions with the default tile size (native-dtype stream,
    # per-vreg upcast inside the kernel).
    preds_bf16 = preds_b.astype(jnp.bfloat16)
    ref_d = burgers_loss_ref(preds_bf16, tgt_b, N_0=N_0b, N_b=N_bb, N_f=N_fb)
    out_d = jax.block_until_ready(
        burgers_loss(preds_bf16, tgt_b, N_0=N_0b, N_b=N_bb, N_f=N_fb))
    assert jnp.allclose(out_d, ref_d, rtol=2e-5, atol=1e-5), (out_d, ref_d)

    print("KERNEL_OK")
</pallas_src>

<mosaic_0001>
module attributes {stable_mosaic.version = 11 : i64} {
  func.func @_burgers_loss_kernel(%arg0: i32, %arg1: memref<64x128xf32, #tpu.memory_space<vmem>>, %arg2: memref<64x128xf32, #tpu.memory_space<vmem>>, %arg3: memref<8x128xf32, #tpu.memory_space<vmem>>) attributes {dimension_semantics = [#tpu.dimension_semantics<arbitrary>], iteration_bounds = array<i64: 1>, scalar_prefetch = 0 : i64, scratch_operands = 0 : i64, tpu.core_type = #tpu.core_type<tc>, window_params = [{transform_indices = @transform_0, window_bounds = array<i64: 64, 128>}, {pipeline_mode = #tpu.pipeline_mode<synchronous>, transform_indices = @transform_1, window_bounds = array<i64: 64, 128>}, {pipeline_mode = #tpu.pipeline_mode<synchronous>, transform_indices = @transform_2, window_bounds = array<i64: 8, 128>}]} {
    %c8192_i32 = arith.constant 8192 : i32
    %0 = arith.muli %arg0, %c8192_i32 : i32
    %c0_i32 = arith.constant 0 : i32
    %1 = arith.cmpi eq, %arg0, %c0_i32 : i32
    %2 = arith.extui %1 : i1 to i32
    %c0_i32_0 = arith.constant 0 : i32
    %3 = arith.cmpi ne, %2, %c0_i32_0 : i32
    scf.if %3 {
      %cst_7 = arith.constant 0.000000e+00 : f32
      %13 = vector.broadcast %cst_7 : f32 to vector<8x128xf32>
      %c0 = arith.constant 0 : index
      %c0_8 = arith.constant 0 : index
      %14 = vector.load %arg3[%c0, %c0_8] : memref<8x128xf32, #tpu.memory_space<vmem>>, vector<8x128xf32>
      tpu.vector_store %arg3[%c0, %c0_8], %13 {strides = array<i32>} : memref<8x128xf32, #tpu.memory_space<vmem>>, vector<8x128xf32>,
    } else {
    }
    %c32_i32 = arith.constant 32 : i32
    %4 = arith.cmpi sge, %0, %c32_i32 : i32
    %c8192_i32_1 = arith.constant 8192 : i32
    %5 = arith.addi %0, %c8192_i32_1 : i32
    %c128_i32 = arith.constant 128 : i32
    %6 = arith.cmpi sle, %5, %c128_i32 : i32
    %7 = arith.andi %4, %6 : i1
    %8 = arith.extui %7 : i1 to i32
    %cst = arith.constant 0.010416667 : f32
    %c0_i32_2 = arith.constant 0 : i32
    %9 = arith.cmpi ne, %8, %c0_i32_2 : i32
    scf.if %9 {
      %cst_7 = arith.constant 0.000000e+00 : f32
      %13 = vector.broadcast %cst_7 : f32 to vector<8x128xf32>
      %c0_i32_8 = arith.constant 0 : i32
      %c64_i32 = arith.constant 64 : i32
      %14 = arith.muli %c0_i32_8, %c64_i32 : i32
      %15 = arith.index_cast %14 : i32 to index
      %c0 = arith.constant 0 : index
      %16 = vector.load %arg1[%15, %c0] : memref<64x128xf32, #tpu.memory_space<vmem>>, vector<64x128xf32>
      %17 = arith.mulf %16, %16 : vector<64x128xf32>
      %18 = vector.shape_cast %17 : vector<64x128xf32> to vector<8x8x128xf32>
      %cst_9 = arith.constant dense<0.000000e+00> : vector<8x128xf32>
      %19 = vector.multi_reduction <add>, %18, %cst_9 [0] : vector<8x8x128xf32> to vector<8x128xf32>
      %20 = arith.addf %13, %19 : vector<8x128xf32>
      %c1_i32 = arith.constant 1 : i32
      %c0_10 = arith.constant 0 : index
      %c0_11 = arith.constant 0 : index
      %21 = vector.load %arg3[%c0_10, %c0_11] : memref<8x128xf32, #tpu.memory_space<vmem>>, vector<8x128xf32>
      %22 = vector.broadcast %cst : f32 to vector<8x128xf32>
      %23 = arith.mulf %20, %22 : vector<8x128xf32>
      %24 = arith.addf %21, %23 : vector<8x128xf32>
      %c0_12 = arith.constant 0 : index
      %c0_13 = arith.constant 0 : index
      %25 = vector.load %arg3[%c0_12, %c0_13] : memref<8x128xf32, #tpu.memory_space<vmem>>, vector<8x128xf32>
      tpu.vector_store %arg3[%c0_12, %c0_13], %24 {strides = array<i32>} : memref<8x128xf32, #tpu.memory_space<vmem>>, vector<8x128xf32>,
    } else {
    }
    %true = arith.constant true
    %10 = arith.xori %7, %true : i1
    %11 = arith.extui %10 : i1 to i32
    %cst_3 = arith.constant 0.010416667 : f32
    %cst_4 = arith.constant 1.250000e-01 : f32
    %cst_5 = arith.constant 6.250000e-02 : f32
    %c0_i32_6 = arith.constant 0 : i32
    %12 = arith.cmpi ne, %11, %c0_i32_6 : i32
    scf.if %12 {
      %cst_7 = arith.constant 0.000000e+00 : f32
      %13 = vector.broadcast %cst_7 : f32 to vector<8x128xf32>
      %c0_i32_8 = arith.constant 0 : i32
      %c64_i32 = arith.constant 64 : i32
      %14 = arith.muli %c0_i32_8, %c64_i32 : i32
      %15 = arith.index_cast %14 : i32 to index
      %c0 = arith.constant 0 : index
      %16 = vector.load %arg1[%15, %c0] : memref<64x128xf32, #tpu.memory_space<vmem>>, vector<64x128xf32>
      %17 = tpu.iota {dimensions = array<i32: 0>} : vector<64x128xi32>
      %18 = tpu.iota {dimensions = array<i32: 1>} : vector<64x128xi32>
      %c128_i32_9 = arith.constant 128 : i32
      %19 = arith.muli %14, %c128_i32_9 : i32
      %20 = arith.addi %0, %19 : i32
      %c128_i32_10 = arith.constant 128 : i32
      %21 = vector.broadcast %c128_i32_10 : i32 to vector<64x128xi32>
      %22 = arith.muli %17, %21 : vector<64x128xi32>
      %23 = vector.broadcast %20 : i32 to vector<64x128xi32>
      %24 = arith.addi %23, %22 : vector<64x128xi32>
      %25 = arith.addi %24, %18 : vector<64x128xi32>
      %c128_i32_11 = arith.constant 128 : i32
      %26 = vector.broadcast %c128_i32_11 : i32 to vector<64x128xi32>
      %27 = arith.cmpi slt, %25, %26 : vector<64x128xi32>
      %cst_12 = arith.constant 0.000000e+00 : f32
      %28 = vector.broadcast %cst_12 : f32 to vector<64x128xf32>
      %29 = arith.select %27, %16, %28 : vector<64x128xi1>, vector<64x128xf32>
      %c16_i32 = arith.constant 16 : i32
      %30 = vector.broadcast %c16_i32 : i32 to vector<64x128xi32>
      %31 = arith.cmpi slt, %25, %30 : vector<64x128xi32>
      %c16_i32_13 = arith.constant 16 : i32
      %32 = vector.broadcast %c16_i32_13 : i32 to vector<64x128xi32>
      %33 = arith.cmpi sge, %25, %32 : vector<64x128xi32>
      %c32_i32_14 = arith.constant 32 : i32
      %34 = vector.broadcast %c32_i32_14 : i32 to vector<64x128xi32>
      %35 = arith.cmpi slt, %25, %34 : vector<64x128xi32>
      %36 = arith.andi %33, %35 : vector<64x128xi1>
      %cst_15 = arith.constant 0.000000e+00 : f32
      %37 = vector.broadcast %cst_3 : f32 to vector<64x128xf32>
      %38 = vector.broadcast %cst_15 : f32 to vector<64x128xf32>
      %39 = arith.select %27, %37, %38 : vector<64x128xi1>, vector<64x128xf32>
      %40 = vector.broadcast %cst_4 : f32 to vector<64x128xf32>
      %41 = arith.select %36, %40, %39 : vector<64x128xi1>, vector<64x128xf32>
      %42 = vector.broadcast %cst_5 : f32 to vector<64x128xf32>
      %43 = arith.select %31, %42, %41 : vector<64x128xi1>, vector<64x128xf32>
      %c0_i32_16 = arith.constant 0 : i32
      %44 = arith.minsi %c0_i32_8, %c0_i32_16 : i32
      %c64_i32_17 = arith.constant 64 : i32
      %45 = arith.muli %44, %c64_i32_17 : i32
      %46 = arith.index_cast %45 : i32 to index
      %c0_18 = arith.constant 0 : index
      %47 = vector.load %arg2[%46, %c0_18] : memref<64x128xf32, #tpu.memory_space<vmem>>, vector<64x128xf32>
      %48 = arith.subf %29, %47 : vector<64x128xf32>
      %49 = arith.select %31, %48, %29 : vector<64x128xi1>, vector<64x128xf32>
      %50 = arith.mulf %43, %49 : vector<64x128xf32>
      %51 = arith.mulf %50, %49 : vector<64x128xf32>
      %52 = vector.shape_cast %51 : vector<64x128xf32> to vector<8x8x128xf32>
      %cst_19 = arith.constant dense<0.000000e+00> : vector<8x128xf32>
      %53 = vector.multi_reduction <add>, %52, %cst_19 [0] : vector<8x8x128xf32> to vector<8x128xf32>
      %54 = arith.addf %13, %53 : vector<8x128xf32>
      %c1_i32 = arith.constant 1 : i32
      %c0_20 = arith.constant 0 : index
      %c0_21 = arith.constant 0 : index
      %55 = vector.load %arg3[%c0_20, %c0_21] : memref<8x128xf32, #tpu.memory_space<vmem>>, vector<8x128xf32>
      %56 = arith.addf %55, %54 : vector<8x128xf32>
      %c0_22 = arith.constant 0 : index
      %c0_23 = arith.constant 0 : index
      %57 = vector.load %arg3[%c0_22, %c0_23] : memref<8x128xf32, #tpu.memory_space<vmem>>, vector<8x128xf32>
      tpu.vector_store %arg3[%c0_22, %c0_23], %56 {strides = array<i32>} : memref<8x128xf32, #tpu.memory_space<vmem>>, vector<8x128xf32>,
    } else {
    }
    return
  }
  func.func @transform_0(%arg0: i32) -> (i32, i32) {
    %c0_i32 = arith.constant 0 : i32
    %c0_i32_0 = arith.constant 0 : i32
    return %arg0, %c0_i32 : i32, i32
  }
  func.func @transform_1(%arg0: i32) -> (i32, i32) {
    %c0_i32 = arith.constant 0 : i32
    %c0_i32_0 = arith.constant 0 : i32
    %c0_i32_1 = arith.constant 0 : i32
    return %c0_i32, %c0_i32_0 : i32, i32
  }
  func.func @transform_2(%arg0: i32) -> (i32, i32) {
    %c0_i32 = arith.constant 0 : i32
    %c0_i32_0 = arith.constant 0 : i32
    %c0_i32_1 = arith.constant 0 : i32
    return %c0_i32, %c0_i32_0 : i32, i32
  }
}

</mosaic_0001>

<bundles_post_ra>
// kernel: tpu_custom_call.1
= control target key start
LH: loop header
LB: loop body
LE: loop exit
PB: predicated region body
PF: predicated region fallthrough
CT: control target
= control target key end

     0   :  { %7 = vsyncpa [#allocation3], 0  ;;  %s618_s0 = inlined_call_operand.hbm [shape: f32[64,128], index: 0, kind: input, shape index: {}]   ;;  %s619_s1 = inlined_call_operand.hbm [shape: f32[64,128], index: 1, kind: input, shape index: {}]   ;;  %s620_s2 = inlined_call_operand.hbm [shape: f32[8,128], index: 2, kind: output, shape index: {}]  }
   0x1   :  { %8 = vsyncpa [#allocation6], 0 }
   0x2   :  { %9 = vsyncpa [#allocation4], 0  ;;  %s345_s9 = smov [#allocation2]   ;;  %s273_s13 = scalar_lea.hbm %s618_s0, 1024 }
   0x3   :  { %s15_s10 = sshll.u32 %s345_s9, 4  ;;  %p274_p0 = scmp.ne.s32.totalorder %s618_s0, %s273_s13  ;;  %s16_s10 = int_to_ptr.vmem [resolvable:$true] %s15_s10 }
   0x4   :  { %p277_p1 = scmp.lt.u32.totalorder %s273_s13, %s618_s0 }
   0x6   :  { %p279_p2 = pnand %p277_p1, %p274_p0 }
   0x8   :  { %282 = shalt.err (!%p279_p2)
}
   0x9   :  { %s283_s18 = scalar_lea.vmem %s16_s10, 1024  ;;  %p288_p4 = scmp.lt.s32.totalorder %s16_s10, %s16_s10 }
   0xa   :  { %p284_p3 = scmp.ne.s32.totalorder %s16_s10, %s283_s18  ;;  %p289_p5 = scmp.lt.s32.totalorder %s283_s18, %s283_s18 }
   0xc   :  { %p290_p6 = por %p289_p5, %p288_p4 }
   0xe   :  { %p291_p7 = pnand %p290_p6, %p284_p3 }
  0x10   :  { %294 = shalt.err (!%p291_p7)
}
  0x11   :  { %s346_s19 = smov 128   ;;  %s347_s20 = smov 8  }
  0x12   :  { %21 = dma.hbm_to_vmem [thread:$0]  %s618_s0, 1024, %s16_s10, [#allocation3], %s346_s19, %s346_s19, %s347_s20  }
  0x13   :  { %s348_s23 = smov [#allocation5]   ;;  %s295_s27 = scalar_lea.hbm %s619_s1, 1024 }
  0x14   :  { %s27_s24 = sshll.u32 %s348_s23, 4  ;;  %p296_p8 = scmp.ne.s32.totalorder %s619_s1, %s295_s27  ;;  %s28_s24 = int_to_ptr.vmem [resolvable:$true] %s27_s24 }
  0x15   :  { %p299_p9 = scmp.lt.u32.totalorder %s295_s27, %s619_s1 }
  0x17   :  { %p301_p10 = pnand %p299_p9, %p296_p8 }
  0x19   :  { %304 = shalt.err (!%p301_p10)
}
  0x1a   :  { %s305_s4 = scalar_lea.vmem %s28_s24, 1024  ;;  %p310_p12 = scmp.lt.s32.totalorder %s28_s24, %s28_s24 }
  0x1b   :  { %p306_p11 = scmp.ne.s32.totalorder %s28_s24, %s305_s4  ;;  %p311_p13 = scmp.lt.s32.totalorder %s305_s4, %s305_s4 }
  0x1d   :  { %p312_p0 = por %p311_p13, %p310_p12 }
  0x1f   :  { %p313_p1 = pnand %p312_p0, %p306_p11 }
  0x21   :  { %316 = shalt.err (!%p313_p1)
}
  0x22   :  { %33 = dma.hbm_to_vmem [thread:$0]  %s619_s1, 1024, %s28_s24, [#allocation6], %s346_s19, %s346_s19, %s347_s20  }
  0x23   :  { %339 = dma.done.wait [#allocation3], 1024  }
  0x24   :  { %340 = vsyncadd [#allocation3], 4294966272 }
  0x25   :  { %341 = dma.done.wait [#allocation6], 1024  }
  0x26   :  { %342 = vsyncadd [#allocation6], 4294966272  ;;  %v92_v0 = vlaneseq  ;;  %v84_v25 = vld [vmem:[#allocation2] sm:$0xff]  ;;  %v85_v26 = vld [vmem:[#allocation2 + $0x8] sm:$0xff]  ;;  %v349_v46 = vmov 0.0   ;;  %s350_s1 = smov [#allocation7]  }
  0x27   :  { %v86_v27 = vld [vmem:[#allocation2 + $0x10] sm:$0xff]  ;;  %v87_v29 = vld [vmem:[#allocation2 + $0x18] sm:$0xff]  ;;  %v88_v30 = vld [vmem:[#allocation2 + $0x20] sm:$0xff]  ;;  %s257_s6 = sshll.u32 %s350_s1, 4  ;;  %s258_s6 = int_to_ptr.vmem [resolvable:$true] %s257_s6 }
  0x28   :  { %v93_v1 = vshrl.u32 %v92_v0, 7  ;;  %v102_v2 = vand.u32 127, %v92_v0  ;;  %v89_v31 = vld [vmem:[#allocation2 + $0x28] sm:$0xff]  ;;  %v90_v32 = vld [vmem:[#allocation2 + $0x30] sm:$0xff]  ;;  %v91_v33 = vld [vmem:[#allocation2 + $0x38] sm:$0xff]  ;;  %s317_s7 = scalar_lea.vmem %s258_s6, 128  ;;  %p322_p3 = scmp.lt.s32.totalorder %s258_s6, %s258_s6 }
  0x29   :  { %v200_v43 = vld [vmem:[#allocation5] sm:$0xff]  ;;  %v201_v44 = vld [vmem:[#allocation5 + $0x8] sm:$0xff]  ;;  %v202_v48 = vld [vmem:[#allocation5 + $0x10] sm:$0xff]  ;;  %p318_p2 = scmp.ne.s32.totalorder %s258_s6, %s317_s7  ;;  %p323_p4 = scmp.lt.s32.totalorder %s317_s7, %s317_s7 }
  0x2a   :  { %v94_v3 = vadd.s32 8, %v93_v1  ;;  %v95_v4 = vadd.s32 16, %v93_v1  ;;  %v96_v5 = vadd.s32 24, %v93_v1  ;;  %v97_v6 = vadd.s32 32, %v93_v1  ;;  %v203_v57 = vld [vmem:[#allocation5 + $0x18] sm:$0xff]  ;;  %v204_v58 = vld [vmem:[#allocation5 + $0x20] sm:$0xff] }
  0x2b   :  { %v98_v7 = vadd.s32 40, %v93_v1  ;;  %v99_v8 = vadd.s32 48, %v93_v1  ;;  %v100_v9 = vadd.s32 56, %v93_v1  ;;  %v103_v10 = vmul.u32 128, %v93_v1  ;;  %v205_v0 = vld [vmem:[#allocation5 + $0x28] sm:$0xff]  ;;  %p324_p5 = por %p323_p4, %p322_p3 }
  0x2c   :  { %v104_v11 = vmul.u32 128, %v94_v3  ;;  %v105_v12 = vmul.u32 128, %v95_v4 }
  0x2d   :  { %v106_v13 = vmul.u32 128, %v96_v5  ;;  %v107_v14 = vmul.u32 128, %v97_v6  ;;  %v390_v15 = vadd.s32 %v103_v10, %v102_v2  ;;  %p325_p6 = pnand %p324_p5, %p318_p2 }
  0x2e   :  { %v108_v16 = vmul.u32 128, %v98_v7  ;;  %v109_v17 = vmul.u32 128, %v99_v8  ;;  %v392_v18 = vadd.s32 %v104_v11, %v102_v2  ;;  %v394_v19 = vadd.s32 %v105_v12, %v102_v2  ;;  %v206_v8 = vld [vmem:[#allocation5 + $0x30] sm:$0xff] }
  0x2f   :  { %v110_v20 = vmul.u32 128, %v100_v9  ;;  %v396_v21 = vadd.s32 %v106_v13, %v102_v2  ;;  %v398_v22 = vadd.s32 %v107_v14, %v102_v2  ;;  %vm128_vm0 = vcmp.lt.s32.totalorder %v390_v15, 128 }
  0x30   :  { %v400_v23 = vadd.s32 %v108_v16, %v102_v2  ;;  %v402_v24 = vadd.s32 %v109_v17, %v102_v2  ;;  %vm129_vm1 = vcmp.lt.s32.totalorder %v392_v18, 128  ;;  %vm130_vm2 = vcmp.lt.s32.totalorder %v394_v19, 128 }
  0x31   :  { %v404_v28 = vadd.s32 %v110_v20, %v102_v2  ;;  %vm625_vm3 = vcmp.lt.s32.totalorder %v396_v21, 128  ;;  %vm624_vm4 = vcmp.lt.s32.totalorder %v398_v22, 128  ;;  %v416_v34 = vsel %vm128_vm0, %v84_v25, 0.0  ;;  %v207_v25 = vld [vmem:[#allocation5 + $0x38] sm:$0xff] }
  0x32   :  { %vm623_vm5 = vcmp.lt.s32.totalorder %v400_v23, 128  ;;  %vm621_vm6 = vcmp.lt.s32.totalorder %v402_v24, 128  ;;  %v420_v35 = vsel %vm129_vm1, %v85_v26, 0.0  ;;  %v424_v36 = vsel %vm130_vm2, %v86_v27, 0.0 }
  0x33   :  { %vm622_vm7 = vcmp.lt.s32.totalorder %v404_v28, 128  ;;  %v428_v37 = vsel %vm625_vm3, %v87_v29, 0.0  ;;  %v432_v38 = vsel %vm624_vm4, %v88_v30, 0.0  ;;  %v436_v39 = vsel %vm623_vm5, %v89_v31, 0.0 }
  0x34   :  { %v440_v40 = vsel %vm621_vm6, %v90_v32, 0.0  ;;  %v444_v41 = vsel %vm622_vm7, %v91_v33, 0.0  ;;  %vm152_vm8 = vcmp.ge.s32.totalorder %v390_v15, 16  ;;  %vm153_vm12 = vcmp.ge.s32.totalorder %v392_v18, 16 }
  0x35   :  { %vm154_vm14 = vcmp.ge.s32.totalorder %v394_v19, 16  ;;  %vm160_vm15 = vcmp.lt.s32.totalorder %v390_v15, 32  ;;  %vm161_vm6 = vcmp.lt.s32.totalorder %v392_v18, 32  ;;  %vm155_vm5 = vcmp.ge.s32.totalorder %v396_v21, 16 }
  0x36   :  { %vm162_vm9 = vcmp.lt.s32.totalorder %v394_v19, 32  ;;  %vm163_vm10 = vcmp.lt.s32.totalorder %v396_v21, 32  ;;  %vm459_vm4 = vmand %vm152_vm8, %vm160_vm15  ;;  %vm156_vm11 = vcmp.ge.s32.totalorder %v398_v22, 16  ;;  %vm164_vm3 = vcmp.lt.s32.totalorder %v398_v22, 32 }
  0x37   :  { %vm468_vm7 = vmand %vm153_vm12, %vm161_vm6  ;;  %v176_v47 = vsel %vm128_vm0, 0.010416667, %v349_v46  ;;  %vm157_vm8 = vcmp.ge.s32.totalorder %v400_v23, 16  ;;  %vm165_vm15 = vcmp.lt.s32.totalorder %v400_v23, 32  ;;  %v177_v50 = vsel %vm129_vm1, 0.010416667, %v349_v46 }
  0x38   :  { %vm478_vm13 = vmand %vm154_vm14, %vm162_vm9  ;;  %v178_v51 = vsel %vm130_vm2, 0.010416667, %v349_v46  ;;  %vm158_vm0 = vcmp.ge.s32.totalorder %v402_v24, 16  ;;  %vm634_vm14 = vcmp.lt.s32.totalorder %v396_v21, 128  ;;  %vm635_vm1 = vcmp.lt.s32.totalorder %v398_v22, 128 }
  0x39   :  { %vm493_vm9 = vmand %vm155_vm5, %vm163_vm10  ;;  %v179_v53 = vsel %vm634_vm14, 0.010416667, %v349_v46  ;;  %v180_v54 = vsel %vm635_vm1, 0.010416667, %v349_v46  ;;  %vm166_vm2 = vcmp.lt.s32.totalorder %v402_v24, 32  ;;  %vm167_vm6 = vcmp.lt.s32.totalorder %v404_v28, 32 }
  0x3a   :  { %vm507_vm12 = vmand %vm156_vm11, %vm164_vm3  ;;  %v184_v56 = vsel %vm459_vm4, 0.125, %v176_v47  ;;  %v208_v59 = vsub.f32 %v416_v34, %v200_v43  ;;  %vm151_vm5 = vcmp.lt.s32.totalorder %v404_v28, 16  ;;  %vm640_vm3 = vcmp.lt.s32.totalorder %v400_v23, 128 }
  0x3b   :  { %vm519_vm10 = vmand %vm157_vm8, %vm165_vm15  ;;  %v181_v61 = vsel %vm640_vm3, 0.010416667, %v349_v46  ;;  %v185_v62 = vsel %vm468_vm7, 0.125, %v177_v50  ;;  %v186_v63 = vsel %vm478_vm13, 0.125, %v178_v51  ;;  %v209_v1 = vsub.f32 %v420_v35, %v201_v44 }
  0x3c   :  { %vm641_vm4 = vcmp.lt.s32.totalorder %v402_v24, 128  ;;  %v187_v3 = vsel %vm493_vm9, 0.125, %v179_v53  ;;  %v188_v4 = vsel %vm507_vm12, 0.125, %v180_v54  ;;  %v210_v5 = vsub.f32 %v424_v36, %v202_v48  ;;  %vm547_vm13 = vmand %vm158_vm0, %vm166_vm2 }
  0x3d   :  { %v182_v2 = vsel %vm641_vm4, 0.010416667, %v349_v46  ;;  %vm642_vm11 = vcmp.lt.s32.totalorder %v404_v28, 128  ;;  %vm643_vm7 = vcmp.lt.s32.totalorder %v390_v15, 16  ;;  %v211_v9 = vsub.f32 %v428_v37, %v203_v57 }
  0x3e   :  { %v183_v6 = vsel %vm642_vm11, 0.010416667, %v349_v46  ;;  %v192_v7 = vsel %vm643_vm7, 0.0625, %v184_v56  ;;  %v212_v10 = vsub.f32 %v432_v38, %v204_v58  ;;  %v189_v12 = vsel %vm519_vm10, 0.125, %v181_v61  ;;  %vm650_vm0 = vmmov %vm643_vm7 }
  0x3f   :  { %vm646_vm8 = vcmp.lt.s32.totalorder %v392_v18, 16  ;;  %vm647_vm15 = vcmp.lt.s32.totalorder %v394_v19, 16  ;;  %v213_v16 = vsub.f32 %v436_v39, %v205_v0  ;;  %vm648_vm12 = vcmp.lt.s32.totalorder %v396_v21, 16 }
  0x40   :  { %v193_v13 = vsel %vm646_vm8, 0.0625, %v185_v62  ;;  %v194_v14 = vsel %vm647_vm15, 0.0625, %v186_v63  ;;  %v195_v17 = vsel %vm648_vm12, 0.0625, %v187_v3  ;;  %vm649_vm9 = vcmp.lt.s32.totalorder %v398_v22, 16  ;;  %vm651_vm14 = vmmov %vm646_vm8 }
  0x41   :  { %v196_v20 = vsel %vm649_vm9, 0.0625, %v188_v4  ;;  %v216_v26 = vsel %vm650_vm0, %v208_v59, %v416_v34  ;;  %v217_v27 = vsel %vm651_vm14, %v209_v1, %v420_v35  ;;  %vm652_vm1 = vcmp.ge.s32.totalorder %v404_v28, 16  ;;  %vm655_vm10 = vmmov %vm647_vm15 }
  0x42   :  { %vm572_vm2 = vmand %vm652_vm1, %vm167_vm6  ;;  %v214_v30 = vsub.f32 %v440_v40, %v206_v8  ;;  %v218_v31 = vsel %vm655_vm10, %v210_v5, %v424_v36  ;;  %v190_v32 = vsel %vm547_vm13, 0.125, %v182_v2  ;;  %vm658_vm6 = vcmp.lt.s32.totalorder %v400_v23, 16 }
  0x43   :  { %vm656_vm3 = vmmov %vm648_vm12  ;;  %v197_v33 = vsel %vm658_vm6, 0.0625, %v189_v12  ;;  %v224_v34 = vmul.f32 %v216_v26, %v192_v7  ;;  %v225_v35 = vmul.f32 %v217_v27, %v193_v13  ;;  %v215_v42 = vsub.f32 %v444_v41, %v207_v25 }
  0x44   :  { %v219_v15 = vsel %vm656_vm3, %v211_v9, %v428_v37  ;;  %vm657_vm4 = vmmov %vm649_vm9  ;;  %v226_v21 = vmul.f32 %v218_v31, %v194_v14  ;;  %v191_v22 = vsel %vm572_vm2, 0.125, %v183_v6  ;;  %vm660_vm7 = vcmp.lt.s32.totalorder %v402_v24, 16 }
  0x45   :  { %v220_v18 = vsel %vm657_vm4, %v212_v10, %v432_v38  ;;  %vm659_vm11 = vmmov %vm658_vm6  ;;  %v227_v36 = vmul.f32 %v219_v15, %v195_v17  ;;  %v232_v38 = vmul.f32 %v224_v34, %v216_v26  ;;  %v233_v43 = vmul.f32 %v225_v35, %v217_v27 }
  0x46   :  { %v221_v19 = vsel %vm659_vm11, %v213_v16, %v436_v39  ;;  %v228_v37 = vmul.f32 %v220_v18, %v196_v20  ;;  %v198_v44 = vsel %vm660_vm7, 0.0625, %v190_v32  ;;  %vm661_vm13 = vmmov %vm660_vm7  ;;  %v234_v46 = vmul.f32 %v226_v21, %v218_v31 }
  0x47   :  { %v222_v45 = vsel %vm661_vm13, %v214_v30, %v440_v40  ;;  %v229_v47 = vmul.f32 %v221_v19, %v197_v33  ;;  %v235_v48 = vmul.f32 %v227_v36, %v219_v15  ;;  %v240_v23 = vadd.f32 %v233_v43, %v232_v38 }
  0x48   :  { %v199_v39 = vsel %vm151_vm5, 0.0625, %v191_v22  ;;  %v223_v49 = vsel %vm151_vm5, %v215_v42, %v444_v41  ;;  %v230_v50 = vmul.f32 %v222_v45, %v198_v44  ;;  %v236_v51 = vmul.f32 %v228_v37, %v220_v18 }
  0x49   :  { %v241_v52 = vadd.f32 %v240_v23, %v234_v46  ;;  %v231_v53 = vmul.f32 %v223_v49, %v199_v39  ;;  %v237_v54 = vmul.f32 %v229_v47, %v221_v19 }
  0x4a   :  { %v238_v56 = vmul.f32 %v230_v50, %v222_v45 }
  0x4b   :  { %v242_v55 = vadd.f32 %v241_v52, %v235_v48  ;;  %v239_v40 = vmul.f32 %v231_v53, %v223_v49 }
  0x4d   :  { %v243_v24 = vadd.f32 %v242_v55, %v236_v51 }
  0x4f   :  { %v244_v57 = vadd.f32 %v243_v24, %v237_v54 }
  0x51   :  { %v245_v58 = vadd.f32 %v244_v57, %v238_v56 }
  0x53   :  { %v246_v59 = vadd.f32 %v245_v58, %v239_v40 }
  0x55   :  { %250 = vst [vmem:[#allocation7] sm:$0xff] %v246_v59 }
  0x56   :  { %328 = shalt.err (!%p325_p6)
}
  0x57   :  { %s329_s10 = scalar_lea.hbm %s620_s2, 128 }
  0x58   :  { %p330_p7 = scmp.ne.s32.totalorder %s620_s2, %s329_s10  ;;  %p333_p8 = scmp.lt.u32.totalorder %s329_s10, %s620_s2 }
  0x5a   :  { %p335_p9 = pnand %p333_p8, %p330_p7 }
  0x5c   :  { %338 = shalt.err (!%p335_p9)
}
  0x5d   :  { %260 = dma.vmem_to_hbm [thread:$0]  %s258_s6, 128, %s620_s2, [#allocation4]  }
  0x5e   :  { %343 = dma.done.wait [#allocation4], 128  }
  0x5f   :  { %344 = vsyncadd [#allocation4], 4294967168 }
  0x60   :  { %264 = vsyncpa [#allocation3], 1 }
  0x61   :  { %265 = vsyncpa [#allocation6], 1 }
  0x62   :  { %266 = vsyncpa [#allocation4], 1 }

</bundles_post_ra>
